<compile_context>
chip_gen: v5e
topology: v5e:2x2
jax: 0.10.0
libtpu: 0.0.40
codegen_flags: <defaults>
</compile_context>

<pallas_src>
import jax
import jax.numpy as jnp
from jax.experimental import pallas as pl
from jax.experimental.pallas import tpu as pltpu


def _cdiv(a, b):
    return -(-a // b)


def _round_up(n, m):
    return _cdiv(n, m) * m


def _mlp_kernel(x_ref, w1_ref, b1_ref, w2_ref, b2_ref, o_ref):
    # Layer 1 on the MXU: (TBp, P*in) @ (P*in, P*out), f32 accumulation.
    h = jnp.dot(x_ref[...], w1_ref[...], preferred_element_type=jnp.float32)
    h = jnp.maximum(h + b1_ref[...], 0.0)          # (TBp, P*out) + (1, P*out)

    # Layer 2 (N=1 per packed group) as a block-diagonal MXU dot:
    # (TBp, P*out) @ (P*out, P) -> (TBp, P): one output lane per packed row.
    y = jnp.dot(h, w2_ref[...], preferred_element_type=jnp.float32)
    o_ref[...] = (y + b2_ref[0, 0]).astype(o_ref.dtype)   # SMEM scalar bias


def stock_predict_net(x, w1, b1, w2, b2, *, max_tile_rows=8192, use_bf16=False):
    """x: (B, in) f32; w1: (in, out); b1: (1, out); w2: (out, 1); b2: (1, 1)."""
    B, in_ch = x.shape
    out_ch = w1.shape[1]
    out_dtype = x.dtype

    # Lane-packing factor: pack P batch rows into the 128-lane axis.
    P = max(1, 128 // in_ch)
    Kp = P * in_ch          # packed contraction width (<=128)
    Np = P * out_ch         # packed hidden width

    # Block-diagonal weight prep (done once in the wrapper; tiny constants).
    eye_p = jnp.eye(P, dtype=w1.dtype)
    w1bd = jnp.kron(eye_p, w1)                        # (Kp, Np)
    w2bd = jnp.kron(eye_p, w2.reshape(out_ch, 1))     # (Np, P)
    b1t = jnp.tile(b1.reshape(1, out_ch), (1, P))     # (1, Np)
    b2s = b2.reshape(1, 1)                            # SMEM scalar

    # Packed-row tiling: TBp packed rows per grid step (multiple of 8).
    rows = _cdiv(B, P)
    TBp = min(max(_cdiv(max_tile_rows, P), 8), _round_up(rows, 8))
    TBp = _round_up(TBp, 8)
    G = _cdiv(rows, TBp)
    # v7x: if everything landed in one tile but there is enough work, split in
    # two so "parallel" can shard across both TensorCores (no-op v5e/v6e).
    if G == 1 and rows > 8:
        TBp = _round_up(_cdiv(rows, 2), 8)
        G = _cdiv(rows, TBp)
    rows_pad = G * TBp
    B_pad = rows_pad * P

    if B_pad == B:
        x_packed = x.reshape(rows_pad, Kp)            # zero-copy reshape
    else:
        # Padded rows compute relu(b1) @ w2 + b2 and are sliced off below.
        x_packed = jnp.pad(x, ((0, B_pad - B), (0, 0))).reshape(rows_pad, Kp)

    if use_bf16:
        # Optional bandwidth optimization (v6e/v7x); f32 accumulation kept.
        x_packed = x_packed.astype(jnp.bfloat16)
        w1bd = w1bd.astype(jnp.bfloat16)

    out_packed = pl.pallas_call(
        _mlp_kernel,
        out_shape=jax.ShapeDtypeStruct((rows_pad, P), out_dtype),
        grid=(G,),
        in_specs=[
            # x: tiled over packed batch rows (auto-pipelined, double-buffered)
            pl.BlockSpec((TBp, Kp), lambda i: (i, 0)),
            # weights / bias1: constant index_maps -> fetched once, resident
            pl.BlockSpec((Kp, Np), lambda i: (0, 0)),
            pl.BlockSpec((1, Np), lambda i: (0, 0)),
            pl.BlockSpec((Np, P), lambda i: (0, 0)),
            # b2: SMEM scalar (no padded VMEM tile)
            pl.BlockSpec(memory_space=pltpu.MemorySpace.SMEM),
        ],
        out_specs=pl.BlockSpec((TBp, P), lambda i: (i, 0)),
        compiler_params=pltpu.CompilerParams(
            dimension_semantics=("parallel",),
        ),
    )(x_packed, w1bd, b1t, w2bd, b2s)

    return out_packed.reshape(B_pad, 1)[:B]


def init_params(key, in_channel, out_channel, dtype=jnp.float32):
    """PyTorch-Linear-style init: uniform(-1/sqrt(fan_in), 1/sqrt(fan_in))."""
    k1, k2, k3, k4 = jax.random.split(key, 4)
    bound1 = 1.0 / (in_channel ** 0.5)
    bound2 = 1.0 / (out_channel ** 0.5)
    # stored transposed relative to PyTorch (out, in) -> (in, out)
    w1 = jax.random.uniform(k1, (in_channel, out_channel), dtype, -bound1, bound1)
    b1 = jax.random.uniform(k2, (1, out_channel), dtype, -bound1, bound1)
    w2 = jax.random.uniform(k3, (out_channel, 1), dtype, -bound2, bound2)
    b2 = jax.random.uniform(k4, (1, 1), dtype, -bound2, bound2)
    return w1, b1, w2, b2


def reference(x, w1, b1, w2, b2):
    h = jnp.maximum(x @ w1 + b1, 0.0)
    return h @ w2 + b2


if __name__ == "__main__":
    key = jax.random.PRNGKey(0)
    in_channel, out_channel = 16, 32

    kx, kp, kx2 = jax.random.split(key, 3)
    w1, b1, w2, b2 = init_params(kp, in_channel, out_channel)

    # Case 1: batch that fits exactly in one packed row group.
    batch = 8
    x = jax.random.normal(kx, (batch, in_channel), jnp.float32)
    out = jax.block_until_ready(stock_predict_net(x, w1, b1, w2, b2))
    ref = reference(x, w1, b1, w2, b2)
    assert out.shape == (batch, 1)
    assert jnp.allclose(out, ref, atol=1e-4, rtol=1e-4)

    # Case 2: ragged batch -> exercises pad-and-slice remainder handling.
    batch2 = 13
    x2 = jax.random.normal(kx2, (batch2, in_channel), jnp.float32)
    out2 = jax.block_until_ready(stock_predict_net(x2, w1, b1, w2, b2))
    ref2 = reference(x2, w1, b1, w2, b2)
    assert out2.shape == (batch2, 1)
    assert jnp.allclose(out2, ref2, atol=1e-4, rtol=1e-4)

    print("KERNEL_OK")
</pallas_src>

<mosaic_0001>
module attributes {stable_mosaic.version = 11 : i64} {
  func.func @_mlp_kernel(%arg0: i32, %arg1: memref<8x128xf32, #tpu.memory_space<vmem>>, %arg2: memref<128x256xf32, #tpu.memory_space<vmem>>, %arg3: memref<1x256xf32, #tpu.memory_space<vmem>>, %arg4: memref<256x8xf32, #tpu.memory_space<vmem>>, %arg5: memref<1x1xf32, #tpu.memory_space<smem>>, %arg6: memref<8x8xf32, #tpu.memory_space<vmem>>) attributes {dimension_semantics = [#tpu.dimension_semantics<parallel>], iteration_bounds = array<i64: 1>, scalar_prefetch = 0 : i64, scratch_operands = 0 : i64, tpu.core_type = #tpu.core_type<tc>, window_params = [{transform_indices = @transform_0, window_bounds = array<i64: 8, 128>}, {pipeline_mode = #tpu.pipeline_mode<synchronous>, transform_indices = @transform_1, window_bounds = array<i64: 128, 256>}, {pipeline_mode = #tpu.pipeline_mode<synchronous>, transform_indices = @transform_2, window_bounds = array<i64: 1, 256>}, {pipeline_mode = #tpu.pipeline_mode<synchronous>, transform_indices = @transform_3, window_bounds = array<i64: 256, 8>}, {transform_indices = @transform_4, window_bounds = array<i64: 1, 1>}, {transform_indices = @transform_5, window_bounds = array<i64: 8, 8>}]} {
    %c0 = arith.constant 0 : index
    %c0_0 = arith.constant 0 : index
    %0 = vector.load %arg1[%c0, %c0_0] : memref<8x128xf32, #tpu.memory_space<vmem>>, vector<8x128xf32>
    %c0_1 = arith.constant 0 : index
    %c0_2 = arith.constant 0 : index
    %1 = vector.load %arg2[%c0_1, %c0_2] : memref<128x256xf32, #tpu.memory_space<vmem>>, vector<128x256xf32>
    %cst = arith.constant dense<0.000000e+00> : vector<8x256xf32>
    %2 = tpu.matmul %0, %1, %cst {dimension_numbers = #tpu.dot_dimension_numbers<[1], [0], [0], [1], [0, 0, 1, 1], [], []>} : vector<8x128xf32>, vector<128x256xf32>, vector<8x256xf32> -> vector<8x256xf32>
    %c0_3 = arith.constant 0 : index
    %c0_4 = arith.constant 0 : index
    %3 = vector.load %arg3[%c0_3, %c0_4] : memref<1x256xf32, #tpu.memory_space<vmem>>, vector<1x256xf32>
    %4 = vector.broadcast %3 : vector<1x256xf32> to vector<8x256xf32>
    %5 = arith.addf %2, %4 : vector<8x256xf32>
    %cst_5 = arith.constant 0.000000e+00 : f32
    %6 = vector.broadcast %cst_5 : f32 to vector<8x256xf32>
    %7 = arith.maximumf %5, %6 : vector<8x256xf32>
    %c0_6 = arith.constant 0 : index
    %c0_7 = arith.constant 0 : index
    %8 = vector.load %arg4[%c0_6, %c0_7] : memref<256x8xf32, #tpu.memory_space<vmem>>, vector<256x8xf32>
    %cst_8 = arith.constant dense<0.000000e+00> : vector<8x8xf32>
    %9 = tpu.matmul %7, %8, %cst_8 {dimension_numbers = #tpu.dot_dimension_numbers<[1], [0], [0], [1], [0, 0, 1, 1], [], []>} : vector<8x256xf32>, vector<256x8xf32>, vector<8x8xf32> -> vector<8x8xf32>
    %c0_9 = arith.constant 0 : index
    %c0_10 = arith.constant 0 : index
    %10 = memref.load %arg5[%c0_9, %c0_10] : memref<1x1xf32, #tpu.memory_space<smem>>
    %11 = vector.broadcast %10 : f32 to vector<8x8xf32>
    %12 = arith.addf %9, %11 : vector<8x8xf32>
    %c0_11 = arith.constant 0 : index
    %c0_12 = arith.constant 0 : index
    %13 = vector.load %arg6[%c0_11, %c0_12] : memref<8x8xf32, #tpu.memory_space<vmem>>, vector<8x8xf32>
    tpu.vector_store %arg6[%c0_11, %c0_12], %12 {strides = array<i32>} : memref<8x8xf32, #tpu.memory_space<vmem>>, vector<8x8xf32>,
    return
  }
  func.func @transform_0(%arg0: i32) -> (i32, i32) {
    %c0_i32 = arith.constant 0 : i32
    %c0_i32_0 = arith.constant 0 : i32
    return %arg0, %c0_i32 : i32, i32
  }
  func.func @transform_1(%arg0: i32) -> (i32, i32) {
    %c0_i32 = arith.constant 0 : i32
    %c0_i32_0 = arith.constant 0 : i32
    %c0_i32_1 = arith.constant 0 : i32
    return %c0_i32, %c0_i32_0 : i32, i32
  }
  func.func @transform_2(%arg0: i32) -> (i32, i32) {
    %c0_i32 = arith.constant 0 : i32
    %c0_i32_0 = arith.constant 0 : i32
    %c0_i32_1 = arith.constant 0 : i32
    return %c0_i32, %c0_i32_0 : i32, i32
  }
  func.func @transform_3(%arg0: i32) -> (i32, i32) {
    %c0_i32 = arith.constant 0 : i32
    %c0_i32_0 = arith.constant 0 : i32
    %c0_i32_1 = arith.constant 0 : i32
    return %c0_i32, %c0_i32_0 : i32, i32
  }
  func.func @transform_4(%arg0: i32) -> (i32, i32) {
    %c0_i32 = arith.constant 0 : i32
    %c0_i32_0 = arith.constant 0 : i32
    %c0_i32_1 = arith.constant 0 : i32
    return %c0_i32, %c0_i32_0 : i32, i32
  }
  func.func @transform_5(%arg0: i32) -> (i32, i32) {
    %c0_i32 = arith.constant 0 : i32
    %c0_i32_0 = arith.constant 0 : i32
    return %arg0, %c0_i32 : i32, i32
  }
}

</mosaic_0001>

<bundles_post_ra>
// kernel: tpu_custom_call.1
= control target key start
LH: loop header
LB: loop body
LE: loop exit
PB: predicated region body
PF: predicated region fallthrough
CT: control target
= control target key end

     0   :  { %s457_s0 = inlined_call_operand.vmem [shape: f32[8,128], index: 0, kind: input, shape index: {}]   ;;  %s458_s1 = inlined_call_operand.vmem [shape: f32[128,256], index: 1, kind: input, shape index: {}]   ;;  %s459_s2 = inlined_call_operand.vmem [shape: f32[1,256], index: 2, kind: input, shape index: {}]   ;;  %s460_s3 = inlined_call_operand.vmem [shape: f32[256,8], index: 3, kind: input, shape index: {}]   ;;  %s461_s4 = inlined_call_operand.<no memory space> [shape: f32[1,1], index: 4, kind: input, shape index: {}]   ;;  %s462_s5 = inlined_call_operand.hbm [shape: f32[8,8], index: 5, kind: output, shape index: {}]  }
   0x1   :  { %v53_v0 = vld [vmem:[%s458_s1 + $0xf0] sm:$0xff]  ;;  %v51_v1 = vld [vmem:[%s458_s1 + $0xe0] sm:$0xff]  ;;  %v54_v2 = vld [vmem:[%s458_s1 + $0xf8] sm:$0xff] }
   0x2   :  { %61 = vmatpush.msra.mxu0 %v53_v0  ;;  %81 = vmatpush.msra.mxu1 %v54_v2  ;;  %v52_v3 = vld [vmem:[%s458_s1 + $0xe8] sm:$0xff]  ;;  %v49_v4 = vld [vmem:[%s458_s1 + $0xd0] sm:$0xff]  ;;  %v50_v5 = vld [vmem:[%s458_s1 + $0xd8] sm:$0xff] }
   0x3   :  { %v47_v6 = vld [vmem:[%s458_s1 + $0xc0] sm:$0xff]  ;;  %v48_v7 = vld [vmem:[%s458_s1 + $0xc8] sm:$0xff]  ;;  %v45_v8 = vld [vmem:[%s458_s1 + $0xb0] sm:$0xff] }
   0x4   :  { %62 = vmatpush.msra.mxu0 %v51_v1  ;;  %82 = vmatpush.msra.mxu1 %v52_v3  ;;  %v46_v9 = vld [vmem:[%s458_s1 + $0xb8] sm:$0xff]  ;;  %v43_v10 = vld [vmem:[%s458_s1 + $0xa0] sm:$0xff]  ;;  %v44_v11 = vld [vmem:[%s458_s1 + $0xa8] sm:$0xff] }
   0x5   :  { %v41_v12 = vld [vmem:[%s458_s1 + $0x90] sm:$0xff]  ;;  %v42_v13 = vld [vmem:[%s458_s1 + $0x98] sm:$0xff]  ;;  %v39_v17 = vld [vmem:[%s458_s1 + $0x80] sm:$0xff] }
   0x6   :  { %63 = vmatpush.msra.mxu0 %v49_v4  ;;  %83 = vmatpush.msra.mxu1 %v50_v5  ;;  %v118_v14 = vld [vmem:[%s460_s3 + $0x78] sm:$0xff]  ;;  %v117_v15 = vld [vmem:[%s460_s3 + $0x70] sm:$0xff]  ;;  %v40_v18 = vld [vmem:[%s458_s1 + $0x88] sm:$0xff] }
   0x7   :  { %v134_v16 = vld [vmem:[%s460_s3 + $0xf8] sm:$0xff]  ;;  %137 = vmatpush.msra.mxu2 %v118_v14  ;;  %v133_v19 = vld [vmem:[%s460_s3 + $0xf0] sm:$0xff]  ;;  %v116_v20 = vld [vmem:[%s460_s3 + $0x68] sm:$0xff] }
   0x8   :  { %64 = vmatpush.msra.mxu0 %v47_v6  ;;  %84 = vmatpush.msra.mxu1 %v48_v7  ;;  %v132_v21 = vld [vmem:[%s460_s3 + $0xe8] sm:$0xff]  ;;  %v37_v22 = vld [vmem:[%s458_s1 + $0x70] sm:$0xff]  ;;  %v38_v23 = vld [vmem:[%s458_s1 + $0x78] sm:$0xff] }
   0x9   :  { %157 = vmatpush.msra.mxu3 %v134_v16  ;;  %138 = vmatpush.msra.mxu2 %v117_v15  ;;  %v115_v24 = vld [vmem:[%s460_s3 + $0x60] sm:$0xff]  ;;  %v36_v27 = vld [vmem:[%s458_s1 + $0x68] sm:$0xff]  ;;  %v114_v28 = vld [vmem:[%s460_s3 + $0x58] sm:$0xff] }
   0xa   :  { %65 = vmatpush.msra.mxu0 %v45_v8  ;;  %85 = vmatpush.msra.mxu1 %v46_v9  ;;  %v131_v25 = vld [vmem:[%s460_s3 + $0xe0] sm:$0xff]  ;;  %v130_v29 = vld [vmem:[%s460_s3 + $0xd8] sm:$0xff]  ;;  %v33_v30 = vld [vmem:[%s458_s1 + $0x50] sm:$0xff] }
   0xb   :  { %158 = vmatpush.msra.mxu3 %v133_v19  ;;  %v35_v26 = vld [vmem:[%s458_s1 + $0x60] sm:$0xff]  ;;  %139 = vmatpush.msra.mxu2 %v116_v20  ;;  %v34_v31 = vld [vmem:[%s458_s1 + $0x58] sm:$0xff]  ;;  %v113_v32 = vld [vmem:[%s460_s3 + $0x50] sm:$0xff] }
   0xc   :  { %66 = vmatpush.msra.mxu0 %v43_v10  ;;  %86 = vmatpush.msra.mxu1 %v44_v11  ;;  %v129_v33 = vld [vmem:[%s460_s3 + $0xd0] sm:$0xff] }
   0xd   :  { %159 = vmatpush.msra.mxu3 %v132_v21  ;;  %140 = vmatpush.msra.mxu2 %v115_v24 }
   0xe   :  { %67 = vmatpush.msra.mxu0 %v41_v12  ;;  %87 = vmatpush.msra.mxu1 %v42_v13 }
   0xf   :  { %160 = vmatpush.msra.mxu3 %v131_v25 }
  0x10   :  { %68 = vmatpush.msra.mxu0 %v39_v17  ;;  %88 = vmatpush.msra.mxu1 %v40_v18 }
  0x12   :  { %69 = vmatpush.msra.mxu0 %v37_v22  ;;  %89 = vmatpush.msra.mxu1 %v38_v23 }
  0x14   :  { %70 = vmatpush.msra.mxu0 %v35_v26  ;;  %90 = vmatpush.msra.mxu1 %v36_v27 }
  0x15   :  { %11 = vsyncpa [#allocation4], 0  ;;  %v31_v34 = vld [vmem:[%s458_s1 + $0x40] sm:$0xff]  ;;  %v32_v35 = vld [vmem:[%s458_s1 + $0x48] sm:$0xff]  ;;  %141 = vmatpush.msra.mxu2 %v114_v28  ;;  %161 = vmatpush.msra.mxu3 %v130_v29  ;;  %v136_v10 = vstv %s461_s4  ;;  %s186_s27 = sshll.u32 %s462_s5, 4  ;;  %vm177_vm0 = vcmask 64512   ;;  %s187_s27 = int_to_ptr.hbm [resolvable:$true] %s186_s27 }
  0x16   :  { %71 = vmatpush.msra.mxu0 %v33_v30  ;;  %91 = vmatpush.msra.mxu1 %v34_v31  ;;  %v112_v36 = vld [vmem:[%s460_s3 + $0x48] sm:$0xff]  ;;  %v29_v38 = vld [vmem:[%s458_s1 + $0x30] sm:$0xff]  ;;  %v30_v39 = vld [vmem:[%s458_s1 + $0x38] sm:$0xff] }
  0x17   :  { %v128_v37 = vld [vmem:[%s460_s3 + $0xc8] sm:$0xff]  ;;  %142 = vmatpush.msra.mxu2 %v113_v32  ;;  %162 = vmatpush.msra.mxu3 %v129_v33  ;;  %v111_v40 = vld [vmem:[%s460_s3 + $0x40] sm:$0xff]  ;;  %v110_v44 = vld [vmem:[%s460_s3 + $0x38] sm:$0xff] }
  0x18   :  { %72 = vmatpush.msra.mxu0 %v31_v34  ;;  %92 = vmatpush.msra.mxu1 %v32_v35  ;;  %v127_v41 = vld [vmem:[%s460_s3 + $0xc0] sm:$0xff]  ;;  %v28_v43 = vld [vmem:[%s458_s1 + $0x28] sm:$0xff]  ;;  %v126_v45 = vld [vmem:[%s460_s3 + $0xb8] sm:$0xff] }
  0x19   :  { %v27_v42 = vld [vmem:[%s458_s1 + $0x20] sm:$0xff]  ;;  %143 = vmatpush.msra.mxu2 %v112_v36  ;;  %163 = vmatpush.msra.mxu3 %v128_v37  ;;  %v25_v46 = vld [vmem:[%s458_s1 + $0x10] sm:$0xff]  ;;  %v26_v47 = vld [vmem:[%s458_s1 + $0x18] sm:$0xff] }
  0x1a   :  { %73 = vmatpush.msra.mxu0 %v29_v38  ;;  %93 = vmatpush.msra.mxu1 %v30_v39  ;;  %v109_v48 = vld [vmem:[%s460_s3 + $0x30] sm:$0xff]  ;;  %v23_v50 = vld [vmem:[%s458_s1] sm:$0xff]  ;;  %v24_v51 = vld [vmem:[%s458_s1 + $0x8] sm:$0xff] }
  0x1b   :  { %144 = vmatpush.msra.mxu2 %v111_v40  ;;  %164 = vmatpush.msra.mxu3 %v127_v41  ;;  %v125_v49 = vld [vmem:[%s460_s3 + $0xb0] sm:$0xff]  ;;  %v22_v52 = vld [vmem:[%s457_s0] sm:$0xff]  ;;  %v108_v53 = vld [vmem:[%s460_s3 + $0x28] sm:$0xff] }
  0x1c   :  { %74 = vmatpush.msra.mxu0 %v27_v42  ;;  %94 = vmatpush.msra.mxu1 %v28_v43  ;;  %v124_v54 = vld [vmem:[%s460_s3 + $0xa8] sm:$0xff]  ;;  %v107_v55 = vld [vmem:[%s460_s3 + $0x20] sm:$0xff]  ;;  %v106_v57 = vld [vmem:[%s460_s3 + $0x18] sm:$0xff] }
  0x1d   :  { %145 = vmatpush.msra.mxu2 %v110_v44  ;;  %165 = vmatpush.msra.mxu3 %v126_v45  ;;  %v123_v56 = vld [vmem:[%s460_s3 + $0xa0] sm:$0xff]  ;;  %v105_v58 = vld [vmem:[%s460_s3 + $0x10] sm:$0xff]  ;;  %v122_v59 = vld [vmem:[%s460_s3 + $0x98] sm:$0xff] }
  0x1e   :  { %75 = vmatpush.msra.mxu0 %v25_v46  ;;  %95 = vmatpush.msra.mxu1 %v26_v47  ;;  %v104_v60 = vld [vmem:[%s460_s3 + $0x8] sm:$0xff]  ;;  %v121_v61 = vld [vmem:[%s460_s3 + $0x90] sm:$0xff]  ;;  %v103_v62 = vld [vmem:[%s460_s3] sm:$0xff] }
  0x1f   :  { %146 = vmatpush.msra.mxu2 %v109_v48  ;;  %166 = vmatpush.msra.mxu3 %v125_v49  ;;  %v120_v63 = vld [vmem:[%s460_s3 + $0x88] sm:$0xff]  ;;  %v119_v0 = vld [vmem:[%s460_s3 + $0x80] sm:$0xff]  ;;  %s222_s3 = smov [#allocation3]  }
  0x20   :  { %76 = vmatpush.msra.mxu0 %v23_v50  ;;  %96 = vmatpush.msra.mxu1 %v24_v51  ;;  %v55_v1 = vld [vmem:[%s459_s2] sm:$0x3]  ;;  %s184_s25 = sshll.u32 %s222_s3, 4  ;;  %s185_s25 = int_to_ptr.vmem [resolvable:$true] %s184_s25 }
  0x21   :  { %77 = vmatmul.f32.vlgmr.msra.gmra.mxu0 %v22_v52  ;;  %97 = vmatmul.f32.vlgmr.msra.gmra.mxu1 %v22_v52  ;;  %v57_v2 = vperm.slane %v55_v1, 0  ;;  %v58_v3 = vperm.slane %v55_v1, 1 }
  0x22   :  { %147 = vmatpush.msra.mxu2 %v108_v53  ;;  %167 = vmatpush.msra.mxu3 %v124_v54 }
  0x24   :  { %148 = vmatpush.msra.mxu2 %v107_v55  ;;  %168 = vmatpush.msra.mxu3 %v123_v56 }
  0x26   :  { %149 = vmatpush.msra.mxu2 %v106_v57  ;;  %169 = vmatpush.msra.mxu3 %v122_v59 }
  0x28   :  { %150 = vmatpush.msra.mxu2 %v105_v58  ;;  %170 = vmatpush.msra.mxu3 %v121_v61 }
  0x2a   :  { %151 = vmatpush.msra.mxu2 %v104_v60  ;;  %171 = vmatpush.msra.mxu3 %v120_v63 }
  0x2c   :  { %152 = vmatpush.msra.mxu2 %v103_v62  ;;  %172 = vmatpush.msra.mxu3 %v119_v0 }
  0x9e   :  { %v78_v4 = vpop.f32.mrf.mxu0  ;;  %v98_v5 = vpop.f32.mrf.mxu1 }
  0x9f   :  { %v79_v6 = vadd.f32 %v78_v4, %v57_v2  ;;  %v99_v7 = vadd.f32 %v98_v5, %v58_v3 }
  0xa1   :  { %v101_v8 = vmax.f32 %v79_v6, 0.0  ;;  %v102_v9 = vmax.f32 %v99_v7, 0.0 }
  0xa3   :  { %153 = vmatmul.f32.vlgmr.msra.gmra.mxu2 %v101_v8  ;;  %173 = vmatmul.f32.vlgmr.msra.gmra.mxu3 %v102_v9 }
 0x126   :  { %v154_v11 = vpop.f32.mrf.mxu2  ;;  %v174_v12 = vpop.f32.mrf.mxu3 }
 0x127   :  { %v155_v13 = vadd.f32 %v154_v11, %v136_v10 }
 0x129   :  { %v175_v14 = vadd.f32 %v174_v12, %v155_v13 }
 0x12b   :  { %178 = vst.msk [vmem:[#allocation3] sm:$0xff] %vm177_vm0, %v175_v14 }
 0x12c   :  { %189 = dma.vmem_to_hbm [thread:$0]  %s185_s25, 128, %s187_s27, [#allocation4]  }
 0x12d   :  { %220 = dma.done.wait [#allocation4], 128  }
 0x12e   :  { %221 = vsyncadd [#allocation4], 4294967168 }
 0x12f   :  { %194 = vsyncpa [#allocation4], 1 }

</bundles_post_ra>
